<compile_context>
chip_gen: v6e
topology: v6e:2x2x1
jax: 0.10.0
libtpu: 0.0.40
codegen_flags: <defaults>
</compile_context>

<pallas_src>
import functools
import math

import jax
import jax.numpy as jnp
from jax import lax
from jax.experimental import pallas as pl
from jax.experimental.pallas import tpu as pltpu


def _xlogx(v):
    # 0*log(0) -> 0 convention (matches KLDivLoss's zero-target handling).
    return 0.0 if v <= 0.0 else float(v) * math.log(v)


def _round_up(x, m):
    return ((x + m - 1) // m) * m


def _label_smoothing_kernel(pred_ref, tgt_ref, kl_out_ref, cnt_out_ref,
                            kl_acc, cnt_acc, *, smooth_val, confidence,
                            c_const, vocab_size, ignore_index, n_rows,
                            tile_n, tiles_per_core):
    c = pl.program_id(0)          # core / parallel axis
    j = pl.program_id(1)          # row-tile / reduction axis

    @pl.when(j == 0)
    def _():
        kl_acc[...] = jnp.zeros_like(kl_acc)
        cnt_acc[...] = jnp.zeros_like(cnt_acc)

    x = pred_ref[...].astype(jnp.float32)            # (TN, V)
    tn, v = x.shape
    tgt = tgt_ref[...]                               # (TN, 1) int32
    ignore = tgt == ignore_index
    tgt_m = jnp.where(ignore, 0, tgt)                # masked_fill(ignore, 0)

    # Which global rows this (core, step) covers; tail / overflow tiles are masked.
    row = lax.broadcasted_iota(jnp.int32, (tn, 1), 0)
    g_tile = c * tiles_per_core + j                  # unclamped global tile index
    row_valid = (g_tile * tile_n + row) < n_rows     # (TN, 1) bool

    # log_softmax pieces (per-row lane reductions).
    m = jnp.max(x, axis=-1, keepdims=True)
    logz = m + jnp.log(jnp.sum(jnp.exp(x - m), axis=-1, keepdims=True))

    # logp[target] via a single select + lane sum.
    col = lax.broadcasted_iota(jnp.int32, (tn, v), 1)
    x_t = jnp.sum(jnp.where(col == tgt_m, x, 0.0), axis=-1, keepdims=True)
    logp_t = x_t - logz                              # (TN, 1)

    kl_rows = jnp.float32(c_const) - jnp.float32(confidence - smooth_val) * logp_t
    if smooth_val > 0.0:                             # trace-time special-case smoothing == 0
        sum_logp = (jnp.sum(x, axis=-1, keepdims=True)
                    - jnp.float32(vocab_size) * logz)
        kl_rows = kl_rows - jnp.float32(smooth_val) * sum_logp

    # Deferred reduction: pure VPU adds into vreg-shaped scratch each step.
    kl_acc[...] += jnp.where(row_valid, kl_rows, 0.0)
    cnt_acc[...] += jnp.where(row_valid & (~ignore), 1.0, 0.0)

    @pl.when(j == pl.num_programs(1) - 1)
    def _():
        kl_out_ref[0] = jnp.sum(kl_acc[...], axis=(0, 1), keepdims=True)
        cnt_out_ref[0] = jnp.sum(cnt_acc[...], axis=(0, 1), keepdims=True)


def label_smoothing_loss(pred, target, *, label_smoothing, vocab_size,
                         ignore_index=-100, tile_n=None, num_cores=2):
    n, v = pred.shape
    assert v == vocab_size
    dtype_bytes = jnp.dtype(pred.dtype).itemsize

    if tile_n is None:
        # Keep the double-buffered pred tile <= ~24 MiB so it fits v7x's 64 MiB VMEM
        # with headroom (also fine on v5e/v6e). Per-step overhead (~0.35us) means we
        # want the tile as large as the budget allows.
        budget = 24 * 1024 * 1024
        max_rows = max(8, budget // (2 * v * dtype_bytes))
        tile_n = int(max(8, min(_round_up(n, 8), (max_rows // 8) * 8, 512)))

    num_tiles = -(-n // tile_n)
    tiles_per_core = -(-num_tiles // num_cores)

    smooth_val = float(label_smoothing) / (vocab_size - 2)
    confidence = 1.0 - float(label_smoothing)
    c_const = _xlogx(confidence) + (vocab_size - 1) * _xlogx(smooth_val)

    tgt2d = target.astype(jnp.int32).reshape(n, 1)

    kernel = functools.partial(
        _label_smoothing_kernel,
        smooth_val=smooth_val, confidence=confidence, c_const=c_const,
        vocab_size=int(vocab_size), ignore_index=int(ignore_index),
        n_rows=int(n), tile_n=int(tile_n), tiles_per_core=int(tiles_per_core))

    def data_map(c, j):
        # Clamp overflow tiles (odd tile counts on the 2-core split); they are
        # fully masked out inside the kernel via row_valid.
        return (jnp.minimum(c * tiles_per_core + j, num_tiles - 1), 0)

    pred_tile_bytes = tile_n * v * dtype_bytes
    vmem_limit = int(min(56 * 1024 * 1024,
                         max(32 * 1024 * 1024, 3 * pred_tile_bytes + (4 << 20))))

    out_kl, out_cnt = pl.pallas_call(
        kernel,
        out_shape=(jax.ShapeDtypeStruct((num_cores, 1, 1), jnp.float32),
                   jax.ShapeDtypeStruct((num_cores, 1, 1), jnp.float32)),
        grid_spec=pltpu.PrefetchScalarGridSpec(
            num_scalar_prefetch=0,
            grid=(num_cores, tiles_per_core),
            in_specs=[
                pl.BlockSpec((tile_n, v), data_map),     # pred row tile (native dtype)
                pl.BlockSpec((tile_n, 1), data_map),     # target row tile
            ],
            out_specs=[
                pl.BlockSpec((1, 1, 1), lambda c, j: (c, 0, 0)),   # per-core KL sum
                pl.BlockSpec((1, 1, 1), lambda c, j: (c, 0, 0)),   # per-core non-ignored count
            ],
            scratch_shapes=[
                pltpu.VMEM((tile_n, 1), jnp.float32),    # per-row KL partials
                pltpu.VMEM((tile_n, 1), jnp.float32),    # per-row count partials
            ]),
        compiler_params=pltpu.CompilerParams(
            dimension_semantics=("parallel", "arbitrary"),
            vmem_limit_bytes=vmem_limit),
    )(pred, tgt2d)

    return jnp.sum(out_kl) / jnp.sum(out_cnt)


def _reference_loss(pred, target, *, label_smoothing, vocab_size, ignore_index=-100):
    smooth_val = label_smoothing / (vocab_size - 2)
    ignore = target == ignore_index
    t = jnp.where(ignore, 0, target)
    true_dist = jnp.full(pred.shape, smooth_val, jnp.float32)
    true_dist = true_dist.at[jnp.arange(pred.shape[0]), t].set(1.0 - label_smoothing)
    logp = jax.nn.log_softmax(pred.astype(jnp.float32), axis=-1)
    kl = jnp.where(true_dist > 0, true_dist * (jnp.log(true_dist) - logp), 0.0)
    return jnp.sum(kl) / jnp.sum(~ignore)


if __name__ == "__main__":
    key = jax.random.PRNGKey(0)
    k_pred, k_tgt, k_ign = jax.random.split(key, 3)

    N, V = 20, 32                       # N deliberately NOT a multiple of the row tile
    label_smoothing = 0.1
    ignore_index = -100

    pred = jax.random.normal(k_pred, (N, V), dtype=jnp.float32)
    target = jax.random.randint(k_tgt, (N,), 0, V, dtype=jnp.int32)
    # Mark a few positions as ignored.
    ign_mask = jax.random.bernoulli(k_ign, 0.25, (N,))
    target = jnp.where(ign_mask, ignore_index, target)

    loss = label_smoothing_loss(pred, target,
                                label_smoothing=label_smoothing,
                                vocab_size=V,
                                ignore_index=ignore_index)
    loss = jax.block_until_ready(loss)

    ref = _reference_loss(pred, target,
                          label_smoothing=label_smoothing,
                          vocab_size=V,
                          ignore_index=ignore_index)
    assert jnp.allclose(loss, ref, rtol=1e-4, atol=1e-4), (loss, ref)
    print("KERNEL_OK")
</pallas_src>

<mosaic_0001>
module attributes {stable_mosaic.version = 11 : i64} {
  func.func @_label_smoothing_kernel(%arg0: i32, %arg1: i32, %arg2: memref<24x32xf32, #tpu.memory_space<vmem>>, %arg3: memref<24x1xi32, #tpu.memory_space<vmem>>, %arg4: memref<1x1x1xf32, #tpu.memory_space<vmem>>, %arg5: memref<1x1x1xf32, #tpu.memory_space<vmem>>, %arg6: memref<24x1xf32, #tpu.memory_space<vmem>>, %arg7: memref<24x1xf32, #tpu.memory_space<vmem>>) attributes {dimension_semantics = [#tpu.dimension_semantics<parallel>, #tpu.dimension_semantics<arbitrary>], iteration_bounds = array<i64: 2, 1>, scalar_prefetch = 0 : i64, scratch_operands = 2 : i64, tpu.core_type = #tpu.core_type<tc>, window_params = [{transform_indices = @transform_0, window_bounds = array<i64: 24, 32>}, {transform_indices = @transform_1, window_bounds = array<i64: 24, 1>}, {transform_indices = @transform_2, window_bounds = array<i64: 1, 1, 1>}, {transform_indices = @transform_3, window_bounds = array<i64: 1, 1, 1>}]} {
    %c0_i32 = arith.constant 0 : i32
    %0 = arith.cmpi eq, %arg1, %c0_i32 : i32
    %1 = arith.extui %0 : i1 to i32
    %c0_i32_0 = arith.constant 0 : i32
    %2 = arith.cmpi ne, %1, %c0_i32_0 : i32
    scf.if %2 {
      %cst_27 = arith.constant 0.000000e+00 : f32
      %62 = vector.broadcast %cst_27 : f32 to vector<24x1xf32>
      %c0_28 = arith.constant 0 : index
      %c0_29 = arith.constant 0 : index
      %63 = vector.load %arg6[%c0_28, %c0_29] : memref<24x1xf32, #tpu.memory_space<vmem>>, vector<24x1xf32>
      tpu.vector_store %arg6[%c0_28, %c0_29], %62 {strides = array<i32>} : memref<24x1xf32, #tpu.memory_space<vmem>>, vector<24x1xf32>,
      %cst_30 = arith.constant 0.000000e+00 : f32
      %64 = vector.broadcast %cst_30 : f32 to vector<24x1xf32>
      %c0_31 = arith.constant 0 : index
      %c0_32 = arith.constant 0 : index
      %65 = vector.load %arg7[%c0_31, %c0_32] : memref<24x1xf32, #tpu.memory_space<vmem>>, vector<24x1xf32>
      tpu.vector_store %arg7[%c0_31, %c0_32], %64 {strides = array<i32>} : memref<24x1xf32, #tpu.memory_space<vmem>>, vector<24x1xf32>,
    } else {
    }
    %c0 = arith.constant 0 : index
    %c0_1 = arith.constant 0 : index
    %3 = vector.load %arg2[%c0, %c0_1] : memref<24x32xf32, #tpu.memory_space<vmem>>, vector<24x32xf32>
    %c0_2 = arith.constant 0 : index
    %c0_3 = arith.constant 0 : index
    %4 = vector.load %arg3[%c0_2, %c0_3] : memref<24x1xi32, #tpu.memory_space<vmem>>, vector<24x1xi32>
    %c-100_i32 = arith.constant -100 : i32
    %5 = vector.broadcast %c-100_i32 : i32 to vector<24x1xi32>
    %6 = arith.cmpi eq, %4, %5 : vector<24x1xi32>
    %c0_i32_4 = arith.constant 0 : i32
    %7 = vector.broadcast %c0_i32_4 : i32 to vector<24x1xi32>
    %8 = arith.select %6, %7, %4 : vector<24x1xi1>, vector<24x1xi32>
    %9 = tpu.iota {dimensions = array<i32: 0>} : vector<24x1xi32>
    %c1_i32 = arith.constant 1 : i32
    %10 = arith.muli %arg0, %c1_i32 : i32
    %11 = arith.addi %10, %arg1 : i32
    %c24_i32 = arith.constant 24 : i32
    %12 = arith.muli %11, %c24_i32 : i32
    %13 = vector.broadcast %12 : i32 to vector<24x1xi32>
    %14 = arith.addi %13, %9 : vector<24x1xi32>
    %c20_i32 = arith.constant 20 : i32
    %15 = vector.broadcast %c20_i32 : i32 to vector<24x1xi32>
    %16 = arith.cmpi slt, %14, %15 : vector<24x1xi32>
    %cst = arith.constant dense<0xFF800000> : vector<24xf32>
    %17 = vector.multi_reduction <maximumf>, %3, %cst [1] : vector<24x32xf32> to vector<24xf32>
    %18 = vector.shape_cast %17 : vector<24xf32> to vector<24x1xf32>
    %19 = vector.broadcast %18 : vector<24x1xf32> to vector<24x32xf32>
    %20 = arith.subf %3, %19 : vector<24x32xf32>
    %21 = math.exp %20 : vector<24x32xf32>
    %cst_5 = arith.constant dense<0.000000e+00> : vector<24xf32>
    %22 = vector.multi_reduction <add>, %21, %cst_5 [1] : vector<24x32xf32> to vector<24xf32>
    %23 = vector.shape_cast %22 : vector<24xf32> to vector<24x1xf32>
    %24 = math.log %23 : vector<24x1xf32>
    %25 = arith.addf %18, %24 : vector<24x1xf32>
    %26 = tpu.iota {dimensions = array<i32: 1>} : vector<24x32xi32>
    %27 = vector.broadcast %8 : vector<24x1xi32> to vector<24x32xi32>
    %28 = arith.cmpi eq, %26, %27 : vector<24x32xi32>
    %cst_6 = arith.constant 0.000000e+00 : f32
    %29 = vector.broadcast %cst_6 : f32 to vector<24x32xf32>
    %30 = arith.select %28, %3, %29 : vector<24x32xi1>, vector<24x32xf32>
    %cst_7 = arith.constant dense<0.000000e+00> : vector<24xf32>
    %31 = vector.multi_reduction <add>, %30, %cst_7 [1] : vector<24x32xf32> to vector<24xf32>
    %32 = vector.shape_cast %31 : vector<24xf32> to vector<24x1xf32>
    %33 = arith.subf %32, %25 : vector<24x1xf32>
    %cst_8 = arith.constant 0.896666646 : f32
    %34 = vector.broadcast %cst_8 : f32 to vector<24x1xf32>
    %35 = arith.mulf %34, %33 : vector<24x1xf32>
    %cst_9 = arith.constant -0.684215307 : f32
    %36 = vector.broadcast %cst_9 : f32 to vector<24x1xf32>
    %37 = arith.subf %36, %35 : vector<24x1xf32>
    %cst_10 = arith.constant dense<0.000000e+00> : vector<24xf32>
    %38 = vector.multi_reduction <add>, %3, %cst_10 [1] : vector<24x32xf32> to vector<24xf32>
    %39 = vector.shape_cast %38 : vector<24xf32> to vector<24x1xf32>
    %cst_11 = arith.constant 3.200000e+01 : f32
    %40 = vector.broadcast %cst_11 : f32 to vector<24x1xf32>
    %41 = arith.mulf %40, %25 : vector<24x1xf32>
    %42 = arith.subf %39, %41 : vector<24x1xf32>
    %cst_12 = arith.constant 0.00333333341 : f32
    %43 = vector.broadcast %cst_12 : f32 to vector<24x1xf32>
    %44 = arith.mulf %43, %42 : vector<24x1xf32>
    %45 = arith.subf %37, %44 : vector<24x1xf32>
    %c0_13 = arith.constant 0 : index
    %c0_14 = arith.constant 0 : index
    %46 = vector.load %arg6[%c0_13, %c0_14] : memref<24x1xf32, #tpu.memory_space<vmem>>, vector<24x1xf32>
    %cst_15 = arith.constant 0.000000e+00 : f32
    %47 = vector.broadcast %cst_15 : f32 to vector<24x1xf32>
    %48 = arith.select %16, %45, %47 : vector<24x1xi1>, vector<24x1xf32>
    %49 = arith.addf %46, %48 : vector<24x1xf32>
    %c0_16 = arith.constant 0 : index
    %c0_17 = arith.constant 0 : index
    %50 = vector.load %arg6[%c0_16, %c0_17] : memref<24x1xf32, #tpu.memory_space<vmem>>, vector<24x1xf32>
    tpu.vector_store %arg6[%c0_16, %c0_17], %49 {strides = array<i32>} : memref<24x1xf32, #tpu.memory_space<vmem>>, vector<24x1xf32>,
    %c0_18 = arith.constant 0 : index
    %c0_19 = arith.constant 0 : index
    %51 = vector.load %arg7[%c0_18, %c0_19] : memref<24x1xf32, #tpu.memory_space<vmem>>, vector<24x1xf32>
    %cst_20 = arith.constant dense<true> : vector<24x1xi1>
    %52 = arith.xori %6, %cst_20 : vector<24x1xi1>
    %53 = arith.andi %16, %52 : vector<24x1xi1>
    %cst_21 = arith.constant 1.000000e+00 : f32
    %cst_22 = arith.constant 0.000000e+00 : f32
    %54 = vector.broadcast %cst_21 : f32 to vector<24x1xf32>
    %55 = vector.broadcast %cst_22 : f32 to vector<24x1xf32>
    %56 = arith.select %53, %54, %55 : vector<24x1xi1>, vector<24x1xf32>
    %57 = arith.addf %51, %56 : vector<24x1xf32>
    %c0_23 = arith.constant 0 : index
    %c0_24 = arith.constant 0 : index
    %58 = vector.load %arg7[%c0_23, %c0_24] : memref<24x1xf32, #tpu.memory_space<vmem>>, vector<24x1xf32>
    tpu.vector_store %arg7[%c0_23, %c0_24], %57 {strides = array<i32>} : memref<24x1xf32, #tpu.memory_space<vmem>>, vector<24x1xf32>,
    %c0_i32_25 = arith.constant 0 : i32
    %59 = arith.cmpi eq, %arg1, %c0_i32_25 : i32
    %60 = arith.extui %59 : i1 to i32
    %c0_i32_26 = arith.constant 0 : i32
    %61 = arith.cmpi ne, %60, %c0_i32_26 : i32
    scf.if %61 {
      %c0_27 = arith.constant 0 : index
      %c0_28 = arith.constant 0 : index
      %62 = vector.load %arg6[%c0_27, %c0_28] : memref<24x1xf32, #tpu.memory_space<vmem>>, vector<24x1xf32>
      %63 = vector.shape_cast %62 : vector<24x1xf32> to vector<1x24x1xf32>
      %cst_29 = arith.constant dense<0.000000e+00> : vector<1xf32>
      %64 = vector.multi_reduction <add>, %63, %cst_29 [1, 2] : vector<1x24x1xf32> to vector<1xf32>
      %65 = vector.shape_cast %64 : vector<1xf32> to vector<1x1x1xf32>
      %66 = vector.extract %65[0, 0, 0] : f32 from vector<1x1x1xf32>
      %67 = vector.broadcast %66 : f32 to vector<1x1xf32>
      %c0_30 = arith.constant 0 : index
      %c0_31 = arith.constant 0 : index
      %c0_32 = arith.constant 0 : index
      %68 = vector.load %arg4[%c0_30, %c0_31, %c0_32] : memref<1x1x1xf32, #tpu.memory_space<vmem>>, vector<1x1x1xf32>
      %69 = vector.shape_cast %68 : vector<1x1x1xf32> to vector<1x1xf32>
      %70 = vector.shape_cast %67 : vector<1x1xf32> to vector<1x1x1xf32>
      tpu.vector_store %arg4[%c0_30, %c0_31, %c0_32], %70 {strides = array<i32>} : memref<1x1x1xf32, #tpu.memory_space<vmem>>, vector<1x1x1xf32>,
      %c0_33 = arith.constant 0 : index
      %c0_34 = arith.constant 0 : index
      %71 = vector.load %arg7[%c0_33, %c0_34] : memref<24x1xf32, #tpu.memory_space<vmem>>, vector<24x1xf32>
      %72 = vector.shape_cast %71 : vector<24x1xf32> to vector<1x24x1xf32>
      %cst_35 = arith.constant dense<0.000000e+00> : vector<1xf32>
      %73 = vector.multi_reduction <add>, %72, %cst_35 [1, 2] : vector<1x24x1xf32> to vector<1xf32>
      %74 = vector.shape_cast %73 : vector<1xf32> to vector<1x1x1xf32>
      %75 = vector.extract %74[0, 0, 0] : f32 from vector<1x1x1xf32>
      %76 = vector.broadcast %75 : f32 to vector<1x1xf32>
      %c0_36 = arith.constant 0 : index
      %c0_37 = arith.constant 0 : index
      %c0_38 = arith.constant 0 : index
      %77 = vector.load %arg5[%c0_36, %c0_37, %c0_38] : memref<1x1x1xf32, #tpu.memory_space<vmem>>, vector<1x1x1xf32>
      %78 = vector.shape_cast %77 : vector<1x1x1xf32> to vector<1x1xf32>
      %79 = vector.shape_cast %76 : vector<1x1xf32> to vector<1x1x1xf32>
      tpu.vector_store %arg5[%c0_36, %c0_37, %c0_38], %79 {strides = array<i32>} : memref<1x1x1xf32, #tpu.memory_space<vmem>>, vector<1x1x1xf32>,
    } else {
    }
    return
  }
  func.func @transform_0(%arg0: i32, %arg1: i32) -> (i32, i32) {
    %c1_i32 = arith.constant 1 : i32
    %0 = arith.muli %arg0, %c1_i32 : i32
    %1 = arith.addi %0, %arg1 : i32
    %c0_i32 = arith.constant 0 : i32
    %2 = arith.minsi %1, %c0_i32 : i32
    %c0_i32_0 = arith.constant 0 : i32
    %c0_i32_1 = arith.constant 0 : i32
    return %2, %c0_i32_0 : i32, i32
  }
  func.func @transform_1(%arg0: i32, %arg1: i32) -> (i32, i32) {
    %c1_i32 = arith.constant 1 : i32
    %0 = arith.muli %arg0, %c1_i32 : i32
    %1 = arith.addi %0, %arg1 : i32
    %c0_i32 = arith.constant 0 : i32
    %2 = arith.minsi %1, %c0_i32 : i32
    %c0_i32_0 = arith.constant 0 : i32
    %c0_i32_1 = arith.constant 0 : i32
    return %2, %c0_i32_0 : i32, i32
  }
  func.func @transform_2(%arg0: i32, %arg1: i32) -> (i32, i32, i32) {
    %c0_i32 = arith.constant 0 : i32
    %c0_i32_0 = arith.constant 0 : i32
    %c0_i32_1 = arith.constant 0 : i32
    return %arg0, %c0_i32, %c0_i32_0 : i32, i32, i32
  }
  func.func @transform_3(%arg0: i32, %arg1: i32) -> (i32, i32, i32) {
    %c0_i32 = arith.constant 0 : i32
    %c0_i32_0 = arith.constant 0 : i32
    %c0_i32_1 = arith.constant 0 : i32
    return %arg0, %c0_i32, %c0_i32_0 : i32, i32, i32
  }
}

</mosaic_0001>

<bundles_post_ra>
// kernel: tpu_custom_call.1
= control target key start
LH: loop header
LB: loop body
LE: loop exit
PB: predicated region body
PF: predicated region fallthrough
CT: control target
= control target key end

     0   :  { %s649_s12 = smov 0   ;;  %s651_s13 = smov 0   ;;  %s785_s0 = inlined_call_operand.vmem [shape: f32[20,32], index: 0, kind: input, shape index: {}]   ;;  %s786_s1 = inlined_call_operand.vmem [shape: s32[20,1], index: 1, kind: input, shape index: {}]   ;;  %s787_s2 = inlined_call_operand.vmem [shape: f32[2,1,1], index: 2, kind: output, shape index: {0}]   ;;  %s788_s3 = inlined_call_operand.vmem [shape: f32[2,1,1], index: 3, kind: output, shape index: {1}]  }
   0x1   :  { %s653_s14 = smov 0  }
   0x2 LB: > { %s26_s15 = sadd.s32 1, %s620_s13  ;;  %p552_p0 = scmp.ge.s32.totalorder %s624_s14, 1  ;;  %s624_s14 = sphi %s653_s14, %s14_s14   ;;  %s620_s13 = sphi %s651_s13, %s790_s13   ;;  %s616_s12 = sphi %s649_s12, %s789_s12  }
   0x3   : > { %p28_p1 = scmp.ge.s32.totalorder %s26_s15, 2  ;;  %p188_p2 = scmp.lt.s32.totalorder %s624_s14, 3 }
   0x5   : > { %s792_s15 = smov (%p28_p1, %s26_s15), 0  ;;  %p189_p3 = pnand %p552_p0, %p188_p2 }
   0x6   : > { %p225_p4 = scmp.lt.s32.totalorder (!%p189_p3), %s616_s12, 0  ;;  %s282_s16 = smul.u32 (!%p189_p3), 24, %s616_s12 }
   0x7   : > { %192 = sbr.rel (%p189_p3) target bundleno = 568 (0x238), region = 28  ;;  %p248_p6 = scmp.lt.s32.totalorder (!%p189_p3), %s616_s12, 1 }
   0xc   : > { %vm258_vm0 = vcmask 7168   ;;  %v626_v0 = vmov 0   ;;  %v627_v1 = vmov 0.0   ;;  %s226_s17 = scalar_select %p225_p4, %s616_s12, 0  ;;  %v277_v2 = vlaneseq }
   0xd   : > { %588 = vset.pattern.permute.xlu1 %v626_v0  ;;  %262 = vst.msk [vmem:[#allocation3] sm:$0xff] %vm258_vm0, %v627_v1  ;;  %259 = vst.msk [vmem:[#allocation2] sm:$0xff] %vm258_vm0, %v627_v1  ;;  %589 = vset.pattern.permute.xlu0 %v626_v0  ;;  %v283_v4 = vstv %s282_s16  ;;  %vm290_vm1 = vcmask 261120   ;;  %vm628_vm4 = vmmov 1   ;;  %s796_s12 = smov (!%p248_p6, %s616_s12), 1 }
   0xe   : > { %260 = vst.msk [vmem:[#allocation2 + $0x8] sm:$0xff] %vm258_vm0, %v627_v1  ;;  %261 = vst.msk [vmem:[#allocation2 + $0x10] sm:$0xff] %vm258_vm0, %v627_v1  ;;  %s227_s18 = smul.u32 3, %s226_s17  ;;  %v278_v3 = vshrl.u32 %v277_v2, 7  ;;  %v328_v40 = vand.u32 127, %v277_v2  ;;  %s250_s28 = scalar_lea.vmem %s787_s2, %s796_s12 }
   0xf   : > { %263 = vst.msk [vmem:[#allocation3 + $0x8] sm:$0xff] %vm258_vm0, %v627_v1  ;;  %264 = vst.msk [vmem:[#allocation3 + $0x10] sm:$0xff] %vm258_vm0, %v627_v1  ;;  %s253_s5 = scalar_lea.vmem %s788_s3, %s796_s12 }
  0x10   : > { %p228_p5 = scmp.lt.s32.totalorder %s227_s18, 2  ;;  %v280_v5 = vadd.s32 16, %v278_v3  ;;  %v679_v6 = vadd.s32 %v283_v4, %v278_v3  ;;  %v279_v7 = vadd.s32 8, %v278_v3 }
  0x12   : > { %s794_s18 = smov (!%p228_p5, %s227_s18), 2  ;;  %v687_v8 = vadd.s32 %v283_v4, %v280_v5  ;;  %vm287_vm2 = vcmp.lt.s32.totalorder %v679_v6, 20  ;;  %v700_v16 = vadd.s32 %v283_v4, %v279_v7 }
  0x13   : > { %s553_s19 = sshll.u32 %s794_s18, 3 }
  0x14   : > { %s231_s22 = scalar_lea.vmem %s785_s0, %s553_s19  ;;  %s243_s25 = scalar_lea.vmem %s786_s1, %s553_s19  ;;  %v396_v18 = vld [vmem:[#allocation3] sm:$0xff]  ;;  %vm289_vm6 = vcmp.lt.s32.totalorder %v687_v8, 20  ;;  %vm288_vm10 = vcmp.lt.s32.totalorder %v700_v16, 20 }
  0x15   : > { %v689_v9 = vld [vmem:[%s231_s22] sm:$0xff]  ;;  %v691_v10 = vld [vmem:[%s231_s22 + $0x10] sm:$0xff]  ;;  %v693_v11 = vld [vmem:[%s231_s22 + $0x8] sm:$0xff] }
  0x16   : > { %v291_v12 = vsel %vm290_vm1, %v689_v9, -inf  ;;  %v297_v13 = vsel %vm290_vm1, %v691_v10, -inf  ;;  %v268_v14 = vld [vmem:[%s243_s25] sm:$0xff]  ;;  %v270_v15 = vld [vmem:[%s243_s25 + $0x10] sm:$0xff]  ;;  %v294_v17 = vsel %vm290_vm1, %v693_v11, -inf  ;;  %v269_v19 = vld [vmem:[%s243_s25 + $0x8] sm:$0xff] }
  0x17   : > { %292 = vmax.xlane.f32.xlu0 %v291_v12  ;;  %298 = vmax.xlane.f32.xlu1 %v297_v13  ;;  %vm271_vm3 = vcmp.eq.s32.totalorder %v268_v14, 4294967196  ;;  %vm273_vm8 = vcmp.eq.s32.totalorder %v270_v15, 4294967196  ;;  %v398_v21 = vld [vmem:[#allocation3 + $0x10] sm:$0xff]  ;;  %vm272_vm12 = vcmp.eq.s32.totalorder %v269_v19, 4294967196  ;;  %v397_v24 = vld [vmem:[#allocation3 + $0x8] sm:$0xff]  ;;  %v368_v51 = vsel %vm290_vm1, %v691_v10, 0.0 }
  0x18   : > { %vm399_vm5 = vmxor %vm271_vm3, %vm628_vm4  ;;  %v274_v28 = vsel %vm271_vm3, 0, %v268_v14  ;;  %v276_v29 = vsel %vm273_vm8, 0, %v270_v15  ;;  %v275_v30 = vsel %vm272_vm12, 0, %v269_v19  ;;  %v362_v57 = vsel %vm290_vm1, %v689_v9, 0.0 }
  0x19   : > { %vm402_vm7 = vmand %vm287_vm2, %vm399_vm5  ;;  %v365_v58 = vsel %vm290_vm1, %v693_v11, 0.0 }
  0x1a   : > { %v405_v20 = vsel %vm402_vm7, 1.0, %v627_v1  ;;  %vm401_vm9 = vmxor %vm273_vm8, %vm628_vm4 }
  0x1b   : > { %295 = vmax.xlane.f32.xlu0 %v294_v17  ;;  %v408_v22 = vadd.f32 %v405_v20, %v396_v18  ;;  %vm404_vm11 = vmand %vm289_vm6, %vm401_vm9 }
  0x1c   : > { %v407_v23 = vsel %vm404_vm11, 1.0, %v627_v1  ;;  %vm400_vm13 = vmxor %vm272_vm12, %vm628_vm4 }
  0x1d   : > { %411 = vst.msk [vmem:[#allocation3] sm:$0xff] %vm258_vm0, %v408_v22  ;;  %v410_v25 = vadd.f32 %v407_v23, %v398_v21  ;;  %vm403_vm14 = vmand %vm288_vm10, %vm400_vm13 }
  0x1e   : > { %v406_v26 = vsel %vm403_vm14, 1.0, %v627_v1 }
  0x1f   : > { %413 = vst.msk [vmem:[#allocation3 + $0x10] sm:$0xff] %vm258_vm0, %v410_v25  ;;  %v409_v27 = vadd.f32 %v406_v26, %v397_v24 }
  0x21   : > { %412 = vst.msk [vmem:[#allocation3 + $0x8] sm:$0xff] %vm258_vm0, %v409_v27 }
  0x24   : > { %v437_v59 = vld [vmem:[#allocation3] sm:$0xff] }
  0x25   : > { %v440_v62 = vsel %vm258_vm0, %v437_v59, 0.0 }
  0x26   : > { %v439_v61 = vld [vmem:[#allocation3 + $0x10] sm:$0xff] }
  0x27   : > { %v443_v0 = vsel %vm258_vm0, %v439_v61, 0.0 }
  0x28   : > { %330 = vperm.xlu1 %588, %v274_v28   ;;  %v438_v60 = vld [vmem:[#allocation3 + $0x8] sm:$0xff] }
  0x29   : > { %v441_v63 = vsel %vm258_vm0, %v438_v60, 0.0 }
  0x2a   : > { %v442_v1 = vadd.f32 %v441_v63, %v440_v62 }
  0x2c   : > { %336 = vperm.xlu1 %588, %v276_v29   ;;  %v444_v2 = vadd.f32 %v443_v0, %v442_v1 }
  0x31   : > { %333 = vperm.xlu0 %589, %v275_v30  }
  0xa0   : > { %v722_v31 = vpop.xlane.xlu0 %292  ;;  %v724_v32 = vpop.xlane.xlu1 %298 }
  0xa1   : > { %v300_v33 = vsub.f32 %v689_v9, %v722_v31  ;;  %v302_v34 = vsub.f32 %v691_v10, %v724_v32 }
  0xa3   : > { %v303_v35 = vmul.f32 1.442695, %v300_v33  ;;  %v307_v36 = vmul.f32 1.442695, %v302_v34 }
  0xa4   : > { %v730_v37 = vpop.xlane.xlu0 %295  ;;  %v331_v42 = vpop.permute.xlu1 %330 }
  0xa5   : > { %590 = vpow2.f32 %v303_v35  ;;  %v301_v38 = vsub.f32 %v693_v11, %v730_v37  ;;  %vm338_vm15 = vcmp.eq.s32.totalorder %v328_v40, %v331_v42 }
  0xa6   : > { %592 = vpow2.f32 %v307_v36  ;;  %v341_v48 = vsel %vm338_vm15, %v689_v9, 0.0  ;;  %v383_v36 = vld [vmem:[#allocation2] sm:$0xff] }
  0xa7   : > { %v305_v39 = vmul.f32 1.442695, %v301_v38  ;;  %v344_v50 = vsel %vm290_vm1, %v341_v48, 0.0  ;;  %v384_v48 = vld [vmem:[#allocation2 + $0x8] sm:$0xff] }
  0xa8   : > { %v337_v52 = vpop.permute.xlu1 %336 }
  0xa9   : > { %594 = vpow2.f32 %v305_v39  ;;  %vm340_vm4 = vcmp.eq.s32.totalorder %v328_v40, %v337_v52 }
  0xaa   : > { %v343_v55 = vsel %vm340_vm4, %v691_v10, 0.0 }
  0xab   : > { %v350_v56 = vsel %vm290_vm1, %v343_v55, 0.0 }
  0xac   : > { %v334_v45 = vpop.permute.xlu0 %333 }
  0xad   : > { %vm339_vm3 = vcmp.eq.s32.totalorder %v328_v40, %v334_v45 }
  0xae   : > { %v342_v53 = vsel %vm339_vm3, %v693_v11, 0.0 }
  0xaf   : > { %v347_v54 = vsel %vm290_vm1, %v342_v53, 0.0 }
  0xb2   : > { %v591_v41 = vpop.eup %590 }
  0xb3   : > { %v593_v43 = vpop.eup %592  ;;  %v309_v44 = vsel %vm290_vm1, %v591_v41, 0.0 }
  0xb4   : > { %310 = vadd.xlane.f32.xlu1 %v309_v44  ;;  %v315_v46 = vsel %vm290_vm1, %v593_v43, 0.0 }
  0xb6   : > { %v595_v47 = vpop.eup %594 }
  0xb7   : > { %v312_v49 = vsel %vm290_vm1, %v595_v47, 0.0 }
  0xb8   : > { %316 = vadd.xlane.f32.xlu1 %v315_v46  ;;  %313 = vadd.xlane.f32.xlu0 %v312_v49  ;;  %v385_v46 = vld [vmem:[#allocation2 + $0x10] sm:$0xff] }
  0xbc   : > { %345 = vadd.xlane.f32.xlu1 %v344_v50  ;;  %369 = vadd.xlane.f32.xlu0 %v368_v51 }
  0xc0   : > { %348 = vadd.xlane.f32.xlu1 %v347_v54  ;;  %445 = vadd.xlane.f32.xlu0 %v444_v2 }
  0xc4   : > { %351 = vadd.xlane.f32.xlu1 %v350_v56 }
  0xc8   : > { %363 = vadd.xlane.f32.xlu1 %v362_v57 }
  0xcc   : > { %366 = vadd.xlane.f32.xlu1 %v365_v58 }
 0x13d   : > { %v311_v3 = vpop.xlane.xlu1 %310 }
 0x13e   : > { %596 = vlog2.f32 %v311_v3 }
 0x141   : > { %v317_v4 = vpop.xlane.xlu1 %316  ;;  %v314_v5 = vpop.xlane.xlu0 %313 }
 0x142   : > { %598 = vlog2.f32 %v317_v4 }
 0x143   : > { %600 = vlog2.f32 %v314_v5 }
 0x145   : > { %v346_v7 = vpop.xlane.xlu1 %345  ;;  %v370_v26 = vpop.xlane.xlu0 %369 }
 0x149   : > { %v349_v9 = vpop.xlane.xlu1 %348  ;;  %v446_v16 = vpop.xlane.xlu0 %445 }
 0x14a   : > { %v447_v60 = vrot.slane %v446_v16, 4 }
 0x14b   : > { %v597_v10 = vpop.eup %596 }
 0x14c   : > { %v319_v11 = vmul.f32 0.6931472, %v597_v10  ;;  %v448_v61 = vadd.f32 %v447_v60, %v446_v16 }
 0x14d   : > { %v352_v12 = vpop.xlane.xlu1 %351 }
 0x14e   : > { %v324_v13 = vadd.f32 %v319_v11, %v722_v31  ;;  %v449_v62 = vrot.slane %v448_v61, 2 }
 0x14f   : > { %v599_v14 = vpop.eup %598 }
 0x150   : > { %v601_v15 = vpop.eup %600  ;;  %v323_v17 = vmul.f32 0.6931472, %v599_v14  ;;  %v353_v18 = vsub.f32 %v346_v7, %v324_v13  ;;  %v371_v19 = vmul.f32 32.0, %v324_v13  ;;  %v450_v2 = vadd.f32 %v449_v62, %v448_v61 }
 0x151   : > { %v321_v20 = vmul.f32 0.6931472, %v601_v15  ;;  %v364_v21 = vpop.xlane.xlu1 %363 }
 0x152   : > { %v356_v22 = vmul.f32 0.89666665, %v353_v18  ;;  %v326_v23 = vadd.f32 %v323_v17, %v724_v32  ;;  %v374_v24 = vsub.f32 %v364_v21, %v371_v19  ;;  %v451_v5 = vrot.slane %v450_v2, 1 }
 0x153   : > { %v325_v25 = vadd.f32 %v321_v20, %v730_v37 }
 0x154   : > { %v359_v27 = vsub.f32 -0.6842153, %v356_v22  ;;  %v355_v28 = vsub.f32 %v352_v12, %v326_v23  ;;  %v377_v29 = vmul.f32 0.0033333334, %v374_v24  ;;  %v373_v30 = vmul.f32 32.0, %v326_v23 }
 0x155   : > { %v354_v33 = vsub.f32 %v349_v9, %v325_v25  ;;  %v367_v31 = vpop.xlane.xlu1 %366  ;;  %v372_v34 = vmul.f32 32.0, %v325_v25  ;;  %v452_v10 = vadd.f32 %v451_v5, %v450_v2 }
 0x156   : > { %v358_v35 = vmul.f32 0.89666665, %v355_v28  ;;  %v380_v38 = vsub.f32 %v359_v27, %v377_v29  ;;  %v376_v39 = vsub.f32 %v370_v26, %v373_v30 }
 0x157   : > { %v357_v40 = vmul.f32 0.89666665, %v354_v33  ;;  %v375_v41 = vsub.f32 %v367_v31, %v372_v34 }
 0x158   : > { %v361_v42 = vsub.f32 -0.6842153, %v358_v35  ;;  %v386_v32 = vsel %vm287_vm2, %v380_v38, 0.0  ;;  %v379_v43 = vmul.f32 0.0033333334, %v376_v39 }
 0x159   : > { %v360_v37 = vsub.f32 -0.6842153, %v357_v40  ;;  %v389_v44 = vadd.f32 %v386_v32, %v383_v36  ;;  %v378_v45 = vmul.f32 0.0033333334, %v375_v41 }
 0x15a   : > { %v382_v47 = vsub.f32 %v361_v42, %v379_v43 }
 0x15b   : > { %393 = vst.msk [vmem:[#allocation2] sm:$0xff] %vm258_vm0, %v389_v44  ;;  %v381_v49 = vsub.f32 %v360_v37, %v378_v45 }
 0x15c   : > { %v388_v50 = vsel %vm289_vm6, %v382_v47, 0.0 }
 0x15d   : > { %v387_v51 = vsel %vm288_vm10, %v381_v49, 0.0  ;;  %v391_v52 = vadd.f32 %v388_v50, %v385_v46 }
 0x15e   : > { %v390_v53 = vadd.f32 %v387_v51, %v384_v48 }
 0x15f   : > { %395 = vst.msk [vmem:[#allocation2 + $0x10] sm:$0xff] %vm258_vm0, %v391_v52 }
 0x160   : > { %394 = vst.msk [vmem:[#allocation2 + $0x8] sm:$0xff] %vm258_vm0, %v390_v53 }
 0x162   : > { %v417_v6 = vld [vmem:[#allocation2] sm:$0xff] }
 0x163   : > { %v420_v56 = vsel %vm258_vm0, %v417_v6, 0.0 }
 0x166   : > { %v419_v55 = vld [vmem:[#allocation2 + $0x10] sm:$0xff] }
 0x167   : > { %v418_v54 = vld [vmem:[#allocation2 + $0x8] sm:$0xff]  ;;  %v423_v8 = vsel %vm258_vm0, %v419_v55, 0.0 }
 0x168   : > { %v421_v57 = vsel %vm258_vm0, %v418_v54, 0.0  ;;  %vm435_vm0 = vcmask 0  }
 0x169   : > { %v422_v58 = vadd.f32 %v421_v57, %v420_v56 }
 0x16b   : > { %v424_v59 = vadd.f32 %v423_v8, %v422_v58 }
 0x16d   : > { %425 = vadd.xlane.f32.xlu1 %v424_v59 }
 0x1f6   : > { %v426_v63 = vpop.xlane.xlu1 %425 }
 0x1f7   : > { %v427_v0 = vrot.slane %v426_v63, 4 }
 0x1f9   : > { %v428_v1 = vadd.f32 %v427_v0, %v426_v63 }
 0x1fb   : > { %v429_v3 = vrot.slane %v428_v1, 2 }
 0x1fd   : > { %v430_v4 = vadd.f32 %v429_v3, %v428_v1 }
 0x1ff   : > { %v431_v7 = vrot.slane %v430_v4, 1 }
 0x201   : > { %v432_v9 = vadd.f32 %v431_v7, %v430_v4 }
 0x203   : > { %557 = vpush %v432_v9 }
 0x204   : > { %559 = vpush %v452_v10 }
 0x234   : > { %s558_s29 = spop %557 }
 0x235   : > { %v434_v11 = vstv %s558_s29  ;;  %s560_s6 = spop %559 }
 0x236   : > { %436 = vst.msk [vmem:[%s250_s28] sm:$0x1] %vm435_vm0, %v434_v11  ;;  %v454_v12 = vstv %s560_s6 }
 0x237   : > { %455 = vst.msk [vmem:[%s253_s5] sm:$0x1] %vm435_vm0, %v454_v12 }
 0x238 PF: > { %s14_s14 = sadd.s32 1, %s624_s14   ;;  %s789_s12 = smov %s620_s13 }
 0x239   : > { %p11_p7 = scmp.ge.s32.totalorder %s14_s14, 4   ;;  %s790_s13 = smov %s792_s15 }
 0x23b   :  { %13 = sbr.rel (!%p11_p7) target bundleno = 2 (0x2), region = 81 }

</bundles_post_ra>
